<compile_context>
chip_gen: v7x
topology: tpu7x:2x2x1
jax: 0.10.0
libtpu: 0.0.40
codegen_flags: <defaults>
</compile_context>

<pallas_src>
import jax
import jax.numpy as jnp
from jax.experimental import pallas as pl
from jax.experimental.pallas import tpu as pltpu


# ----------------------------- Pallas kernel ------------------------------- #

def _conv_bn_relu_kernel(w_ref, x_ref, scale_ref, shift_ref, o_ref):
    """One (Cout, TM) output tile: relu((W @ X) * scale + shift).

    w_ref:     (Cout, K)  bf16  -- resident across the whole grid
    x_ref:     (K, TM)    bf16  -- im2col patch tile, lane axis = spatial
    scale_ref: (Cout, 1)  f32   -- folded BN scale (broadcast along lanes)
    shift_ref: (Cout, 1)  f32   -- folded BN shift + conv bias
    o_ref:     (Cout, TM) f32
    """
    y = jnp.dot(w_ref[...], x_ref[...], preferred_element_type=jnp.float32)
    y = y * scale_ref[...] + shift_ref[...]
    o_ref[...] = jnp.maximum(y, 0.0).astype(o_ref.dtype)


_LANE = 128
_TM_MAX = 2048                    # 512-2048 lane tiles already ~85% of HBM roofline
_VMEM_BUDGET = 12 * 1024 * 1024   # fits v5e's 16 MiB scoped default with headroom


def _tensorcores_per_chip():
    """Best-effort TensorCore count (v7x: 2/chip, v5e/v6e: 1).  Never raises."""
    try:
        dev = jax.devices()[0]
        for attr in ("num_cores", "core_count"):
            val = getattr(dev, attr, None)
            if isinstance(val, int) and val > 0:
                return val
    except Exception:
        pass
    return 2   # conservative default: assume megacore so v7x keeps 2 blocks/TC


def _pick_tm(m, k, cout, n_batch):
    """Lane-tile size along M = Do*Ho*Wo (per batch element).

    Chosen so that the tile
      * is a 128-multiple divisor of M (unmasked, lane-dense vst),
      * keeps double-buffered x (bf16) + out (f32) blocks under the VMEM budget
        on every generation (hard cap 2048 lanes -- bigger buys nothing),
      * still gives >= 2 grid blocks per TensorCore when cheaply achievable so
        v7x gets per-core pipelining; on single-TC v5e/v6e the extra steps cost
        only ~0.35 us each.
    """
    if m < _LANE or m % _LANE != 0:
        return m                          # tiny/odd spatial size: one full block
    divisors = [d for d in range(_LANE, m + 1, _LANE) if m % d == 0]
    per_lane_bytes = 2 * (k * 2) + 2 * (cout * 4)   # 2x-buffered input + output
    cap = min(_TM_MAX,
              max(_LANE, (_VMEM_BUDGET // per_lane_bytes) // _LANE * _LANE))
    fitting = [d for d in divisors if d <= cap] or [divisors[0]]
    min_steps = 2 * _tensorcores_per_chip()
    for d in sorted(fitting, reverse=True):
        if n_batch * (m // d) >= min_steps:
            return d
    return min(fitting)   # min_steps unreachable: favour more (smaller) blocks


def conv_bn_relu_gemm(w_t, x_t, scale, shift):
    """Batched fused GEMM + folded-BN + ReLU.

    w_t:   (Cout, K)   bf16,  K = 8*Cin with ordering (ci, kd, kh, kw)
    x_t:   (N, K, M)   bf16,  per-batch im2col patch matrix, M = Do*Ho*Wo
    scale: (Cout, 1)   f32
    shift: (Cout, 1)   f32
    returns (N, Cout, M) f32
    """
    cout, k = w_t.shape
    n, _, m = x_t.shape
    tm = _pick_tm(m, k, cout, n)
    return pl.pallas_call(
        _conv_bn_relu_kernel,
        out_shape=jax.ShapeDtypeStruct((n, cout, m), jnp.float32),
        grid_spec=pltpu.PrefetchScalarGridSpec(
            num_scalar_prefetch=0,
            grid=(n, m // tm),
            in_specs=[
                pl.BlockSpec((cout, k), lambda b, j: (0, 0)),        # weights
                pl.BlockSpec((None, k, tm), lambda b, j: (b, 0, j)),  # x tile
                pl.BlockSpec((cout, 1), lambda b, j: (0, 0)),        # scale
                pl.BlockSpec((cout, 1), lambda b, j: (0, 0)),        # shift
            ],
            out_specs=pl.BlockSpec((None, cout, tm), lambda b, j: (b, 0, j)),
        ),
        compiler_params=pltpu.CompilerParams(
            dimension_semantics=("parallel", "parallel")),
    )(w_t, x_t, scale, shift)


# ------------------------------- JAX glue ---------------------------------- #

def _im2col_k2s2_batched(x_ncdhw, dtype=jnp.bfloat16):
    """NCDHW -> per-batch patch matrices (N, 8*Cin, Do*Ho*Wo), in bf16.

    K ordering is (ci, kd, kh, kw), matching a plain reshape of the PyTorch
    weight (Co, Ci, kd, kh, kw) -> (Co, Ci*8).  Odd spatial dims are floored,
    same as Conv3d(kernel=2, stride=2, padding=0).
    """
    n, ci, d, h, w = x_ncdhw.shape
    do, ho, wo = d // 2, h // 2, w // 2
    x = x_ncdhw[:, :, :2 * do, :2 * ho, :2 * wo].astype(dtype)
    x = x.reshape(n, ci, do, 2, ho, 2, wo, 2)
    x = jnp.transpose(x, (0, 1, 3, 5, 7, 2, 4, 6))  # (n, ci, kd, kh, kw, do, ho, wo)
    return x.reshape(n, ci * 8, do * ho * wo), (do, ho, wo)


def _fold_bn(conv_bias, gamma, beta, mean, var, eps=1e-5):
    """Fold conv bias + eval-mode BatchNorm into per-channel scale/shift."""
    s = gamma / jnp.sqrt(var + eps)
    shift = (conv_bias - mean) * s + beta
    return (s.reshape(-1, 1).astype(jnp.float32),
            shift.reshape(-1, 1).astype(jnp.float32))


def conv_block_forward(x_ncdhw, params):
    """conv_block.forward: Conv3d(k=2,s=2,bias) + BatchNorm3d(eval) + ReLU."""
    n = x_ncdhw.shape[0]
    co = params["w"].shape[0]
    x_t, (do, ho, wo) = _im2col_k2s2_batched(x_ncdhw)
    w_t = params["w"].reshape(co, -1).astype(jnp.bfloat16)   # (Co, 8*Ci)
    scale, shift = _fold_bn(params["b"], params["gamma"], params["beta"],
                            params["mean"], params["var"])
    y = conv_bn_relu_gemm(w_t, x_t, scale, shift)            # (N, Co, M) f32
    return y.reshape(n, co, do, ho, wo)                      # free reshape only


# --------------------------- Reference (pure JAX) --------------------------- #

def conv_block_ref(x, params, eps=1e-5):
    y = jax.lax.conv_general_dilated(
        x.astype(jnp.float32), params["w"].astype(jnp.float32),
        window_strides=(2, 2, 2), padding="VALID",
        dimension_numbers=("NCDHW", "OIDHW", "NCDHW"))
    y = y + params["b"].reshape(1, -1, 1, 1, 1)
    s = (params["gamma"] / jnp.sqrt(params["var"] + eps)).reshape(1, -1, 1, 1, 1)
    y = (y - params["mean"].reshape(1, -1, 1, 1, 1)) * s \
        + params["beta"].reshape(1, -1, 1, 1, 1)
    return jnp.maximum(y, 0.0)


# ---------------------------- Parameter setup ------------------------------ #

def init_params(key, in_dim, out_dim):
    keys = iter(jax.random.split(key, 8))

    def nrm(shape, s=0.1):
        return s * jax.random.normal(next(keys), shape, jnp.float32)

    def pos(shape):
        return 0.5 + jax.random.uniform(next(keys), shape, dtype=jnp.float32)

    return dict(w=nrm((out_dim, in_dim, 2, 2, 2)), b=nrm((out_dim,)),
                gamma=pos((out_dim,)), beta=nrm((out_dim,)),
                mean=nrm((out_dim,)), var=pos((out_dim,)))


# ---------------------------------- Main ------------------------------------ #

if __name__ == "__main__":
    N, Cin, Cout, D = 2, 4, 8, 16

    key = jax.random.PRNGKey(0)
    k_in, k_par = jax.random.split(key)
    x = jax.random.normal(k_in, (N, Cin, D, D, D), dtype=jnp.float32)
    params = init_params(k_par, Cin, Cout)

    fwd = jax.jit(conv_block_forward)
    out = jax.block_until_ready(fwd(x, params))

    assert out.shape == (N, Cout, D // 2, D // 2, D // 2), out.shape
    assert bool(jnp.all(jnp.isfinite(out)))
    assert bool(jnp.all(out >= 0.0))        # ReLU output is non-negative

    ref = conv_block_ref(x, params)
    max_err = float(jnp.max(jnp.abs(out - ref)))
    # bf16 GEMM operands with f32 accumulation: allow a slightly looser bound.
    assert max_err < 3e-2, f"max abs error vs reference: {max_err}"

    print("KERNEL_OK")
</pallas_src>

<mosaic_0001>
module attributes {stable_mosaic.version = 11 : i64} {
  func.func @_conv_bn_relu_kernel(%arg0: i32, %arg1: i32, %arg2: memref<8x32xbf16, #tpu.memory_space<vmem>>, %arg3: memref<1x32x256xbf16, #tpu.memory_space<vmem>>, %arg4: memref<8x1xf32, #tpu.memory_space<vmem>>, %arg5: memref<8x1xf32, #tpu.memory_space<vmem>>, %arg6: memref<1x8x256xf32, #tpu.memory_space<vmem>>) attributes {dimension_semantics = [#tpu.dimension_semantics<parallel>, #tpu.dimension_semantics<parallel>], iteration_bounds = array<i64: 2, 2>, scalar_prefetch = 0 : i64, scratch_operands = 0 : i64, tpu.core_type = #tpu.core_type<tc>, window_params = [{pipeline_mode = #tpu.pipeline_mode<synchronous>, transform_indices = @transform_0, window_bounds = array<i64: 8, 32>}, {transform_indices = @transform_1, window_bounds = array<i64: 1, 32, 256>}, {pipeline_mode = #tpu.pipeline_mode<synchronous>, transform_indices = @transform_2, window_bounds = array<i64: 8, 1>}, {pipeline_mode = #tpu.pipeline_mode<synchronous>, transform_indices = @transform_3, window_bounds = array<i64: 8, 1>}, {transform_indices = @transform_4, window_bounds = array<i64: 1, 8, 256>}]} {
    %c0 = arith.constant 0 : index
    %c0_0 = arith.constant 0 : index
    %0 = vector.load %arg2[%c0, %c0_0] : memref<8x32xbf16, #tpu.memory_space<vmem>>, vector<8x32xbf16>
    %c0_1 = arith.constant 0 : index
    %c0_2 = arith.constant 0 : index
    %c0_3 = arith.constant 0 : index
    %1 = vector.load %arg3[%c0_1, %c0_2, %c0_3] : memref<1x32x256xbf16, #tpu.memory_space<vmem>>, vector<1x32x256xbf16>
    %2 = vector.shape_cast %1 : vector<1x32x256xbf16> to vector<32x256xbf16>
    %cst = arith.constant dense<0.000000e+00> : vector<8x256xf32>
    %3 = tpu.matmul %0, %2, %cst {dimension_numbers = #tpu.dot_dimension_numbers<[1], [0], [0], [1], [0, 0, 1, 1], [], []>} : vector<8x32xbf16>, vector<32x256xbf16>, vector<8x256xf32> -> vector<8x256xf32>
    %c0_4 = arith.constant 0 : index
    %c0_5 = arith.constant 0 : index
    %4 = vector.load %arg4[%c0_4, %c0_5] : memref<8x1xf32, #tpu.memory_space<vmem>>, vector<8x1xf32>
    %5 = vector.broadcast %4 : vector<8x1xf32> to vector<8x256xf32>
    %6 = arith.mulf %3, %5 : vector<8x256xf32>
    %c0_6 = arith.constant 0 : index
    %c0_7 = arith.constant 0 : index
    %7 = vector.load %arg5[%c0_6, %c0_7] : memref<8x1xf32, #tpu.memory_space<vmem>>, vector<8x1xf32>
    %8 = vector.broadcast %7 : vector<8x1xf32> to vector<8x256xf32>
    %9 = arith.addf %6, %8 : vector<8x256xf32>
    %cst_8 = arith.constant 0.000000e+00 : f32
    %10 = vector.broadcast %cst_8 : f32 to vector<8x256xf32>
    %11 = arith.maximumf %9, %10 : vector<8x256xf32>
    %c0_9 = arith.constant 0 : index
    %c0_10 = arith.constant 0 : index
    %c0_11 = arith.constant 0 : index
    %12 = vector.load %arg6[%c0_9, %c0_10, %c0_11] : memref<1x8x256xf32, #tpu.memory_space<vmem>>, vector<1x8x256xf32>
    %13 = vector.shape_cast %12 : vector<1x8x256xf32> to vector<8x256xf32>
    %14 = vector.shape_cast %11 : vector<8x256xf32> to vector<1x8x256xf32>
    tpu.vector_store %arg6[%c0_9, %c0_10, %c0_11], %14 {strides = array<i32>} : memref<1x8x256xf32, #tpu.memory_space<vmem>>, vector<1x8x256xf32>,
    return
  }
  func.func @transform_0(%arg0: i32, %arg1: i32) -> (i32, i32) {
    %c0_i32 = arith.constant 0 : i32
    %c0_i32_0 = arith.constant 0 : i32
    %c0_i32_1 = arith.constant 0 : i32
    return %c0_i32, %c0_i32_0 : i32, i32
  }
  func.func @transform_1(%arg0: i32, %arg1: i32) -> (i32, i32, i32) {
    %c0_i32 = arith.constant 0 : i32
    %c0_i32_0 = arith.constant 0 : i32
    return %arg0, %c0_i32, %arg1 : i32, i32, i32
  }
  func.func @transform_2(%arg0: i32, %arg1: i32) -> (i32, i32) {
    %c0_i32 = arith.constant 0 : i32
    %c0_i32_0 = arith.constant 0 : i32
    %c0_i32_1 = arith.constant 0 : i32
    return %c0_i32, %c0_i32_0 : i32, i32
  }
  func.func @transform_3(%arg0: i32, %arg1: i32) -> (i32, i32) {
    %c0_i32 = arith.constant 0 : i32
    %c0_i32_0 = arith.constant 0 : i32
    %c0_i32_1 = arith.constant 0 : i32
    return %c0_i32, %c0_i32_0 : i32, i32
  }
  func.func @transform_4(%arg0: i32, %arg1: i32) -> (i32, i32, i32) {
    %c0_i32 = arith.constant 0 : i32
    %c0_i32_0 = arith.constant 0 : i32
    return %arg0, %c0_i32, %arg1 : i32, i32, i32
  }
}

</mosaic_0001>

<bundles_post_ra>
// kernel: conv_block_forward.1
= control target key start
LH: loop header
LB: loop body
LE: loop exit
PB: predicated region body
PF: predicated region fallthrough
CT: control target
= control target key end

     0   :  { %s623_s15 = smov 0   ;;  %s625_s16 = smov 0   ;;  %s722_s0 = inlined_call_operand.vmem [shape: bf16[8,32], index: 0, kind: input, shape index: {}]   ;;  %s723_s1 = inlined_call_operand.vmem [shape: bf16[2,32,512], index: 1, kind: input, shape index: {}]   ;;  %s724_s2 = inlined_call_operand.vmem [shape: f32[8,1], index: 2, kind: input, shape index: {}]   ;;  %s725_s3 = inlined_call_operand.vmem [shape: f32[8,1], index: 3, kind: input, shape index: {}]   ;;  %s726_s4 = inlined_call_operand.vmem [shape: f32[2,8,512], index: 4, kind: output, shape index: {}]  }
   0x1   :  { %s627_s17 = smov 0   ;;  %s629_s18 = smov 0  }
   0x2   :  { %s631_s19 = smov 0   ;;  %s633_s20 = smov 0  }
   0x3   :  { %s635_s21 = smov 0  }
   0x4 LB: > { %s23_s22 = sadd.s32 1, %s587_s19  ;;  %s26_s23 = sadd.s32 1, %s591_s20  ;;  %s595_s21 = sphi %s635_s21, %s14_s21   ;;  %s591_s20 = sphi %s633_s20, %s732_s20   ;;  %s587_s19 = sphi %s631_s19, %s731_s19   ;;  %s583_s18 = sphi %s629_s18, %s730_s18   ;;  %s579_s17 = sphi %s627_s17, %s729_s17   ;;  %s575_s16 = sphi %s625_s16, %s728_s16   ;;  %s571_s15 = sphi %s623_s15, %s727_s15  }
   0x5   : > { %p24_p0 = scmp.ge.s32.totalorder %s23_s22, 2  ;;  %p63_p1 = scmp.ne.s32.totalorder %s575_s16, %s571_s15 }
   0x6   : > { %p64_p2 = scmp.eq.s32.totalorder %s595_s21, 0  ;;  %s56_s27 = sadd.s32 1, %s575_s16 }
   0x7   : > { %s734_s22 = smov (%p24_p0, %s23_s22), 0  ;;  %s736_s23 = smov (!%p24_p0, %s26_s23), %s591_s20 }
   0x8   : > { %p65_p3 = por %p64_p2, %p63_p1  ;;  %p28_p4 = scmp.ge.s32.totalorder %s736_s23, 2 }
   0x9   : > { %s52_s24 = ssub.s32 %s587_s19, %s734_s22  ;;  %p460_p6 = scmp.ge.s32.totalorder %s595_s21, 4 }
   0xa   : > { %s738_s23 = smov (%p28_p4, %s736_s23), 0 }
   0xb   : > { %s51_s25 = ssub.s32 %s591_s20, %s738_s23  ;;  %168 = sbr.rel (%p460_p6) target bundleno = 27 (0x1b), region = 28 }
   0xc   : > { %s53_s26 = sor.u32 %s52_s24, %s51_s25 }
   0xd   : > { %p54_p5 = scmp.eq.s32.totalorder %s53_s26, 0 }
   0xf   : > { %s674_s28 = scalar_select %p54_p5, %s575_s16, %s56_s27  }
  0x12   : > { %171 = sbr.rel (!%p65_p3) target bundleno = 27 (0x1b), region = 32  ;;  %s173_s29 = sand.u32 (%p65_p3), 1, %s575_s16  }
  0x13   : > { %s462_s30 = sshll.u32 (%p65_p3), %s587_s19, 1  ;;  %s461_s5 = sshll.u32 (%p65_p3), %s173_s29, 5 }
  0x14   : > { %s463_s6 = sshll.u32 (%p65_p3), %s591_s20, 4  ;;  %s175_s12 = scalar_lea.vmem (%p65_p3), [#allocation2], %s461_s5 }
  0x15   : > { %s178_s7 = sadd.s32 (%p65_p3), %s463_s6, %s462_s30 }
  0x16   : > { %s464_s8 = sshll.u32 (%p65_p3), %s178_s7, 2 }
  0x17   : > { %s180_s11 = scalar_lea.vmem (%p65_p3), %s723_s1, %s464_s8 }
  0x18   : > { %v214_v0 = vld [vmem:[%s180_s11] sm:$0xff] (%p65_p3)  ;;  %v216_v1 = vld [vmem:[%s180_s11 + $0x10] sm:$0xff] (%p65_p3) }
  0x19   : > { %v218_v2 = vld [vmem:[%s180_s11 + $0x20] sm:$0xff]  ;;  %215 = vst [vmem:[%s175_s12] sm:$0xff] %v214_v0  ;;  %217 = vst [vmem:[%s175_s12 + $0x8] sm:$0xff] %v216_v1  ;;  %v220_v3 = vld [vmem:[%s180_s11 + $0x30] sm:$0xff] }
  0x1a   : > { %219 = vst [vmem:[%s175_s12 + $0x10] sm:$0xff] %v218_v2  ;;  %221 = vst [vmem:[%s175_s12 + $0x18] sm:$0xff] %v220_v3 }
  0x1b PF: > { %p465_p7 = scmp.ge.s32.totalorder %s595_s21, 1  ;;  %p226_p8 = scmp.lt.s32.totalorder %s595_s21, 5 }
  0x1d   : > { %p227_p9 = pnand %p465_p7, %p226_p8 }
  0x1e   : > { %s233_s13 = sand.u32 (!%p227_p9), 1, %s571_s15   ;;  %v344_v4 = vld [vmem:[%s724_s2] sm:$0xff] (!%p227_p9)  ;;  %v597_v5 = vmov (!%p227_p9), 0   ;;  %vm299_vm0 = vcmask (!%p227_p9), 261120   ;;  %s467_s5 = sshll.u32 (!%p227_p9), %s579_s17, 1 }
  0x1f   : > { %230 = sbr.rel (%p227_p9) target bundleno = 262 (0x106), region = 70  ;;  %s466_s25 = sshll.u32 (!%p227_p9), %s233_s13, 5  ;;  %335 = vmatprep.mubr.bf16.mxu0 (!%p227_p9), %v597_v5  ;;  %534 = vset.pattern.permute.xlu0 (!%p227_p9), %v597_v5  ;;  %v352_v6 = vld [vmem:[%s725_s3] sm:$0xff] (!%p227_p9) }
  0x20   : > { %347 = vperm.xlu0 (!%p227_p9), %534, %v344_v4   ;;  %s235_s29 = scalar_lea.vmem (!%p227_p9), [#allocation2], %s466_s25  ;;  %v274_v11 = vld [vmem:[%s722_s0] sm:$0xf] (!%p227_p9)  ;;  %p264_p10 = scmp.lt.s32.totalorder (!%p227_p9), %s583_s18, 1 }
  0x21   : > { %v535_v7 = vld [vmem:[%s235_s29 + $0x4] ss:$8 sps:$4 sm:$0xff] (!%p227_p9)   ;;  %v537_v8 = vld [vmem:[%s235_s29] ss:$8 sps:$4 sm:$0xff] (!%p227_p9)   ;;  %v538_v9 = vld [vmem:[%s235_s29 + $0x14] ss:$8 sps:$4 sm:$0xff] (!%p227_p9)  }
  0x22   : > { %303 = vmatprep.subr.bf16.mxu0 (!%p227_p9), %v535_v7  ;;  %v540_v10 = vld [vmem:[%s235_s29 + $0x10] ss:$8 sps:$4 sm:$0xff] (!%p227_p9)   ;;  %p266_p11 = scmp.lt.s32.totalorder (!%p227_p9), %s467_s5, 3 }
  0x23   : > { %304 = vmatpush1.bf16.msra.mxu0 (!%p227_p9), %v537_v8 }
  0x24   : > { %355 = vperm.xlu0 (!%p227_p9), %534, %v352_v6   ;;  %305 = vmatprep.subr.bf16.mxu0 (!%p227_p9), %v538_v9 }
  0x26   : > { %s740_s18 = smov (!%p264_p10, %s583_s18), 1  ;;  %s742_s5 = smov (!%p266_p11, %s467_s5), 3 }
  0x27   : > { %306 = vmatpush1.bf16.msra.mxu0 %v540_v10  ;;  %s468_s6 = sshll.u32 %s740_s18, 2 }
  0x28   : > { %s269_s7 = sadd.s32 %s468_s6, %s742_s5 }
  0x29   : > { %s469_s8 = sshll.u32 %s269_s7, 3 }
  0x2a   : > { %474 = vmatmul.mubr.msk.bf16.vlgmr.msra.gmra.mrb[0].mxu0 %vm299_vm0, %v274_v11  ;;  %s271_s17 = scalar_lea.vmem %s726_s4, %s469_s8 }
  0x9f   : > { %v348_v12 = vpop.permute.xlu0 %347 }
  0xa3   : > { %v356_v16 = vpop.permute.xlu0 %355 }
  0xfd   : > { %v337_v13 = vpop.f32.mrb[0].mxu0 }
  0xfe   : > { %v350_v14 = vmul.f32 %v348_v12, %v337_v13  ;;  %v339_v15 = vpop.f32.mrb[1].mxu0 }
  0xff   : > { %v351_v17 = vmul.f32 %v348_v12, %v339_v15  ;;  %v341_v18 = vpop.f32.mrb[2].mxu0 }
 0x100   : > { %v358_v19 = vadd.f32 %v356_v16, %v350_v14  ;;  %v342_v20 = vpop.f32.mrb[3].mxu0 }
 0x101   : > { %v359_v21 = vadd.f32 %v356_v16, %v351_v17 }
 0x102   : > { %v360_v22 = vmax.f32 %v358_v19, 0.0 }
 0x103   : > { %v361_v23 = vmax.f32 %v359_v21, 0.0 }
 0x104   : > { %362 = vst [vmem:[%s271_s17] sm:$0xff] %v360_v22 }
 0x105   : > { %363 = vst [vmem:[%s271_s17 + $0x8] sm:$0xff] %v361_v23 }
 0x106 PF: > { %s14_s21 = sadd.s32 1, %s595_s21   ;;  %s727_s15 = smov %s575_s16 }
 0x107   : > { %p11_p12 = scmp.ge.s32.totalorder %s14_s21, 6   ;;  %s728_s16 = smov %s674_s28 }
 0x108   : > { %s729_s17 = smov %s587_s19  ;;  %s730_s18 = smov %s591_s20 }
 0x109   : > { %s731_s19 = smov %s734_s22  ;;  %s732_s20 = smov %s738_s23 }
 0x10a   :  { %13 = sbr.rel (!%p11_p12) target bundleno = 4 (0x4), region = 109 }

</bundles_post_ra>
